<compile_context>
chip_gen: v6e
topology: v6e:2x2x1
jax: 0.10.0
libtpu: 0.0.40
codegen_flags: <defaults>
</compile_context>

<pallas_src>
import functools

import jax
import jax.numpy as jnp
from jax import lax
from jax.experimental import pallas as pl
from jax.experimental.pallas import tpu as pltpu

BN_EPS = 1e-5
_MIB = 1024 * 1024


def _coordatt_kernel(x_ref, phw_ref, scale_ref, eh_ref, ew_ref,
                     w1_ref, b1_ref, wh_ref, bh_ref, ww_ref, bw_ref,
                     o_ref, pooled_ref=None, *,
                     bt, h, w, fold_batch, unroll_tail):
    c = x_ref.shape[1]
    hw = x_ref.shape[2]
    mip = w1_ref.shape[0]
    oup = wh_ref.shape[0]

    # ---- loop-invariant values, hoisted out of the per-batch tail --------
    phw = phw_ref[...]                         # (HW, H+W)  exact 0/1 bf16 pooling matrix
    scale = scale_ref[...]                     # (1, H+W)   f32: 1/W cols then 1/H cols
    eh = eh_ref[...]                           # (H, HWp)   exact 0/1 bf16 expansion
    ew = ew_ref[...]                           # (W, HWp)
    w1 = w1_ref[...].astype(jnp.bfloat16)      # (mip, C)   BN-folded conv1 weight
    wh = wh_ref[...].astype(jnp.bfloat16)      # (oup, mip)
    ww = ww_ref[...].astype(jnp.bfloat16)      # (oup, mip)
    # Hoisted bias broadcasts (JAX does not CSE broadcast_in_dim inside loops).
    b1b = jnp.broadcast_to(b1_ref[...], (mip, h + w))
    bhb = jnp.broadcast_to(bh_ref[...], (oup, h))
    bwb = jnp.broadcast_to(bw_ref[...], (oup, w))

    # ---- stage 1: both adaptive avg-pools as ONE batch-folded matmul -----
    if fold_batch:
        # (bt, C, HW) -> (bt*C, HW) is a layout-free leading-dim merge because
        # C % 8 == 0, so the whole batch tile fills the MXU M dimension.
        xb = x_ref[...].reshape(bt * c, hw).astype(jnp.bfloat16)
        pooled_ref[...] = (jnp.dot(xb, phw, preferred_element_type=jnp.float32)
                           * scale)                              # (bt*C, H+W) f32

    # ---- stage 2: tiny per-batch tail (conv1 / conv_h / conv_w / expand) -
    def tail(b):
        if fold_batch:
            start = b * c
            if not isinstance(start, int):
                start = pl.multiple_of(start, 8)
            pb = pooled_ref[pl.ds(start, c), :]                  # (C, H+W) f32
        else:
            xb = x_ref[b].astype(jnp.bfloat16)                   # (C, HW)
            pb = jnp.dot(xb, phw, preferred_element_type=jnp.float32) * scale

        # conv1 (1x1, BN pre-folded) + h_swish on the concatenated H|W axis.
        y = jnp.dot(w1, pb.astype(jnp.bfloat16),
                    preferred_element_type=jnp.float32) + b1b    # (mip, H+W)
        y = y * jnp.clip(y + 3.0, 0.0, 6.0) * (1.0 / 6.0)
        yh = y[:, :h]                                            # (mip, H)
        yw = y[:, h:]                                            # (mip, W)

        # conv_h / conv_w (1x1) + sigmoid.
        a_h = jax.nn.sigmoid(
            jnp.dot(wh, yh.astype(jnp.bfloat16),
                    preferred_element_type=jnp.float32) + bhb)   # (oup, H)
        a_w = jax.nn.sigmoid(
            jnp.dot(ww, yw.astype(jnp.bfloat16),
                    preferred_element_type=jnp.float32) + bwb)   # (oup, W)

        # Lane-dense outer product: out[o, hh*W + ww] = a_h[o, hh] * a_w[o, ww].
        out = (jnp.dot(a_h.astype(jnp.bfloat16), eh, preferred_element_type=jnp.float32)
               * jnp.dot(a_w.astype(jnp.bfloat16), ew, preferred_element_type=jnp.float32))
        o_ref[b] = out.astype(o_ref.dtype)

    if unroll_tail:                 # small bt: static unroll (capped at 4)
        for b in range(bt):
            tail(b)
    else:                           # larger bt: bounded live ranges
        def body(b, carry):
            tail(b)
            return carry
        lax.fori_loop(0, bt, body, 0)


def _select_batch_tile(n, c, oup, mip, hw, hw_out, h, w, *,
                       vmem_budget_bytes, target_m=256, min_grid_steps=2):
    """Largest divisor of n whose per-step VMEM footprint fits the budget.

    Prefers keeping >= min_grid_steps grid steps (so both v7x TensorCores get
    work under dimension_semantics=("parallel",)) and stops growing once bt*c
    fills the MXU M dimension (target_m).
    """
    const_bytes = (hw * (h + w) + (h + w) * hw_out) * 2           # phw + eh + ew (bf16)
    const_bytes += (h + w) * 4                                    # pool scale row
    const_bytes += (mip * c + mip + 2 * (oup * mip + oup)) * 4    # conv weights/biases
    const_bytes *= 2                                              # assume double-buffered

    def step_bytes(bt):
        x_blk = bt * c * hw * 4
        o_blk = bt * oup * hw_out * 4
        pooled = bt * c * (h + w) * 4
        return 2 * (x_blk + o_blk) + pooled + const_bytes

    divisors = [d for d in range(1, n + 1) if n % d == 0]
    feasible = [d for d in divisors if step_bytes(d) <= vmem_budget_bytes] or [1]

    def pick(cands):
        filled = [d for d in cands if d * c >= target_m]
        return min(filled) if filled else max(cands)

    multi = [d for d in feasible if n // d >= min_grid_steps]
    bt = pick(multi) if multi else pick(feasible)
    # TODO(synk): prime / awkward n degrades to bt=1; pad n or allow a ragged
    # last tile if per-step amortization matters for such batch sizes.
    return bt, step_bytes(bt)


def coord_att(x, params, *, vmem_budget_bytes=40 * _MIB):
    """CoordAtt forward. x: (N, C, H, W) f32. Returns (N, oup, H, W)."""
    n, c, h, w = x.shape
    hw = h * w
    w1, b1 = params["w1"], params["b1"]
    gamma, beta = params["gamma"], params["beta"]
    mean, var = params["mean"], params["var"]
    wh, bh = params["wh"], params["bh"]
    ww, bw = params["ww"], params["bw"]
    mip = w1.shape[0]
    oup = wh.shape[0]

    # ---- host-side prep ---------------------------------------------------
    # Fold eval-mode (Sync)BatchNorm into conv1 weight/bias.
    # TODO(synk): training-mode SyncBatchNorm cross-replica batch statistics
    # are not implemented; this kernel covers the eval-mode forward only.
    bn_scale = gamma * lax.rsqrt(var + BN_EPS)                 # (mip, 1)
    w1f = (w1 * bn_scale).astype(jnp.float32)                  # (mip, C)
    b1f = ((b1 - mean) * bn_scale + beta).astype(jnp.float32)  # (mip, 1)

    # Pad the OUTPUT spatial axis to a multiple of 128 so every output store
    # is a full-lane vst; the padded columns are produced as zeros by the
    # expansion matrices and sliced off after the kernel.
    hw_out = hw if hw % 128 == 0 else (hw + 127) // 128 * 128

    # Fused pooling matrix (exact 0/1 bf16; the 1/W, 1/H scaling is applied
    # afterwards in f32 so the matrix stays exactly representable):
    #   pooled = x_flat @ phw -> cols [0:H] = sum over W, cols [H:H+W] = sum over H.
    s_in = jnp.arange(hw)
    phw = jnp.concatenate(
        [(s_in[:, None] // w == jnp.arange(h)[None, :]),
         (s_in[:, None] % w == jnp.arange(w)[None, :])], axis=1).astype(jnp.bfloat16)
    pool_scale = jnp.concatenate(
        [jnp.full((h,), 1.0 / w, jnp.float32),
         jnp.full((w,), 1.0 / h, jnp.float32)]).reshape(1, h + w)

    # Expansion matrices: out[o, hh*W + ww] = a_h[o, hh] * a_w[o, ww];
    # columns >= HW have no matching row in eh, so the padded output is zero.
    s_out = jnp.arange(hw_out)
    eh = (jnp.arange(h)[:, None] == s_out[None, :] // w).astype(jnp.bfloat16)  # (H, HWp)
    ew = (jnp.arange(w)[:, None] == s_out[None, :] % w).astype(jnp.bfloat16)   # (W, HWp)

    x_flat = x.reshape(n, c, hw)

    bt, step_bytes = _select_batch_tile(
        n, c, oup, mip, hw, hw_out, h, w, vmem_budget_bytes=vmem_budget_bytes)
    grid = (n // bt,)
    fold_batch = (c % 8 == 0)       # (bt, C, HW) -> (bt*C, HW) is layout-free
    unroll_tail = bt <= 4           # cap static unrolling; fori_loop beyond that

    # Scoped-VMEM limit: enough for this kernel, capped at v7x's 64 MiB physical
    # VMEM (v5e/v6e have 128 MiB; pass a larger vmem_budget_bytes there).
    vmem_limit = int(min(64 * _MIB, max(32 * _MIB, step_bytes + 8 * _MIB)))

    kernel = functools.partial(_coordatt_kernel, bt=bt, h=h, w=w,
                               fold_batch=fold_batch, unroll_tail=unroll_tail)
    consts = (phw, pool_scale, eh, ew, w1f, b1f, wh, bh, ww, bw)

    def build_and_run(single_buffer_consts):
        def const_spec(a):
            idx = lambda i, _nd=a.ndim: (0,) * _nd
            if single_buffer_consts:
                # Grid-invariant operands: no need to double-buffer them.
                return pl.BlockSpec(a.shape, idx, pipeline_mode=pl.Buffered(1))
            return pl.BlockSpec(a.shape, idx)

        scratch = []
        if fold_batch:
            scratch.append(pltpu.VMEM((bt * c, h + w), jnp.float32))

        return pl.pallas_call(
            kernel,
            out_shape=jax.ShapeDtypeStruct((n, oup, hw_out), x.dtype),
            grid_spec=pltpu.PrefetchScalarGridSpec(
                num_scalar_prefetch=0,
                grid=grid,
                in_specs=[pl.BlockSpec((bt, c, hw), lambda i: (i, 0, 0))]
                         + [const_spec(a) for a in consts],
                out_specs=pl.BlockSpec((bt, oup, hw_out), lambda i: (i, 0, 0)),
                scratch_shapes=scratch,
            ),
            compiler_params=pltpu.CompilerParams(
                dimension_semantics=("parallel",),
                vmem_limit_bytes=vmem_limit,
            ),
        )(x_flat, *consts)

    try:
        out_flat = build_and_run(True)
    except Exception:
        # pl.Buffered(1) single-buffering unsupported on this jax/Mosaic build;
        # fall back to default double-buffered constants.
        out_flat = build_and_run(False)

    return out_flat[:, :, :hw].reshape(n, oup, h, w)


def coord_att_reference(x, params):
    """Pure-JAX f32 reference (unfolded BN) for correctness checking."""
    n, c, h, w = x.shape
    x_h = jnp.mean(x, axis=3)                      # (N, C, H)
    x_w = jnp.mean(x, axis=2)                      # (N, C, W)
    y = jnp.concatenate([x_h, x_w], axis=2)        # (N, C, H+W)
    y1 = jnp.einsum("mc,nck->nmk", params["w1"], y) + params["b1"][None]
    inv_std = lax.rsqrt(params["var"] + BN_EPS)
    y1 = (y1 - params["mean"][None]) * inv_std[None] * params["gamma"][None] \
         + params["beta"][None]
    y1 = y1 * jnp.clip(y1 + 3.0, 0.0, 6.0) / 6.0
    yh, yw = y1[:, :, :h], y1[:, :, h:]
    a_h = jax.nn.sigmoid(jnp.einsum("om,nmk->nok", params["wh"], yh)
                         + params["bh"][None])     # (N, oup, H)
    a_w = jax.nn.sigmoid(jnp.einsum("om,nmk->nok", params["ww"], yw)
                         + params["bw"][None])     # (N, oup, W)
    return a_h[:, :, :, None] * a_w[:, :, None, :]


def make_params(key, inp, oup, reduction=4):
    mip = max(8, inp // reduction)
    k = jax.random.split(key, 6)
    return {
        "w1": jax.random.normal(k[0], (mip, inp), jnp.float32) * 0.1,
        "b1": jax.random.normal(k[1], (mip, 1), jnp.float32) * 0.05,
        # SyncBatchNorm default init (eval mode)
        "gamma": jnp.ones((mip, 1), jnp.float32),
        "beta": jnp.zeros((mip, 1), jnp.float32),
        "mean": jnp.zeros((mip, 1), jnp.float32),
        "var": jnp.ones((mip, 1), jnp.float32),
        "wh": jax.random.normal(k[2], (oup, mip), jnp.float32) * 0.1,
        "bh": jax.random.normal(k[3], (oup, 1), jnp.float32) * 0.05,
        "ww": jax.random.normal(k[4], (oup, mip), jnp.float32) * 0.1,
        "bw": jax.random.normal(k[5], (oup, 1), jnp.float32) * 0.05,
    }


if __name__ == "__main__":
    key = jax.random.PRNGKey(0)

    # Case 1: spec shapes (C % 8 != 0 -> per-batch pooling path, static tail).
    n1, inp1, oup1, h1, w1d = 2, 4, 4, 16, 16
    k1x, k1p, key = jax.random.split(key, 3)
    x1 = jax.random.normal(k1x, (n1, inp1, h1, w1d), jnp.float32)
    p1 = make_params(k1p, inp1, oup1)
    out1 = jax.block_until_ready(coord_att(x1, p1))
    ref1 = coord_att_reference(x1, p1)
    assert out1.shape == (n1, oup1, h1, w1d)
    assert jnp.allclose(out1, ref1, atol=1e-2, rtol=1e-2), (
        "case1 mismatch, max abs err %e" % float(jnp.max(jnp.abs(out1 - ref1))))

    # Case 2: C % 8 == 0 -> batch-folded pooling matmul, fori_loop tail, and
    # lane-padded output (HW = 64 -> 128).
    n2, inp2, oup2, h2, w2d = 16, 8, 8, 8, 8
    k2x, k2p = jax.random.split(key)
    x2 = jax.random.normal(k2x, (n2, inp2, h2, w2d), jnp.float32)
    p2 = make_params(k2p, inp2, oup2)
    out2 = jax.block_until_ready(coord_att(x2, p2))
    ref2 = coord_att_reference(x2, p2)
    assert out2.shape == (n2, oup2, h2, w2d)
    assert jnp.allclose(out2, ref2, atol=1e-2, rtol=1e-2), (
        "case2 mismatch, max abs err %e" % float(jnp.max(jnp.abs(out2 - ref2))))

    print("KERNEL_OK")
</pallas_src>

<mosaic_0001>
module attributes {stable_mosaic.version = 11 : i64} {
  func.func @_coordatt_kernel(%arg0: i32, %arg1: memref<1x4x256xf32, #tpu.memory_space<vmem>>, %arg2: memref<256x32xbf16, #tpu.memory_space<vmem>>, %arg3: memref<1x32xf32, #tpu.memory_space<vmem>>, %arg4: memref<16x256xbf16, #tpu.memory_space<vmem>>, %arg5: memref<16x256xbf16, #tpu.memory_space<vmem>>, %arg6: memref<8x4xf32, #tpu.memory_space<vmem>>, %arg7: memref<8x1xf32, #tpu.memory_space<vmem>>, %arg8: memref<4x8xf32, #tpu.memory_space<vmem>>, %arg9: memref<4x1xf32, #tpu.memory_space<vmem>>, %arg10: memref<4x8xf32, #tpu.memory_space<vmem>>, %arg11: memref<4x1xf32, #tpu.memory_space<vmem>>, %arg12: memref<1x4x256xf32, #tpu.memory_space<vmem>>) attributes {dimension_semantics = [#tpu.dimension_semantics<parallel>], iteration_bounds = array<i64: 2>, scalar_prefetch = 0 : i64, scratch_operands = 0 : i64, tpu.core_type = #tpu.core_type<tc>, window_params = [{transform_indices = @transform_0, window_bounds = array<i64: 1, 4, 256>}, {pipeline_mode = #tpu.pipeline_mode<synchronous>, transform_indices = @transform_1, window_bounds = array<i64: 256, 32>}, {pipeline_mode = #tpu.pipeline_mode<synchronous>, transform_indices = @transform_2, window_bounds = array<i64: 1, 32>}, {pipeline_mode = #tpu.pipeline_mode<synchronous>, transform_indices = @transform_3, window_bounds = array<i64: 16, 256>}, {pipeline_mode = #tpu.pipeline_mode<synchronous>, transform_indices = @transform_4, window_bounds = array<i64: 16, 256>}, {pipeline_mode = #tpu.pipeline_mode<synchronous>, transform_indices = @transform_5, window_bounds = array<i64: 8, 4>}, {pipeline_mode = #tpu.pipeline_mode<synchronous>, transform_indices = @transform_6, window_bounds = array<i64: 8, 1>}, {pipeline_mode = #tpu.pipeline_mode<synchronous>, transform_indices = @transform_7, window_bounds = array<i64: 4, 8>}, {pipeline_mode = #tpu.pipeline_mode<synchronous>, transform_indices = @transform_8, window_bounds = array<i64: 4, 1>}, {pipeline_mode = #tpu.pipeline_mode<synchronous>, transform_indices = @transform_9, window_bounds = array<i64: 4, 8>}, {pipeline_mode = #tpu.pipeline_mode<synchronous>, transform_indices = @transform_10, window_bounds = array<i64: 4, 1>}, {transform_indices = @transform_11, window_bounds = array<i64: 1, 4, 256>}]} {
    %c0 = arith.constant 0 : index
    %c0_0 = arith.constant 0 : index
    %0 = vector.load %arg2[%c0, %c0_0] : memref<256x32xbf16, #tpu.memory_space<vmem>>, vector<256x32xbf16>
    %c0_1 = arith.constant 0 : index
    %c0_2 = arith.constant 0 : index
    %1 = vector.load %arg3[%c0_1, %c0_2] : memref<1x32xf32, #tpu.memory_space<vmem>>, vector<1x32xf32>
    %c0_3 = arith.constant 0 : index
    %c0_4 = arith.constant 0 : index
    %2 = vector.load %arg4[%c0_3, %c0_4] : memref<16x256xbf16, #tpu.memory_space<vmem>>, vector<16x256xbf16>
    %c0_5 = arith.constant 0 : index
    %c0_6 = arith.constant 0 : index
    %3 = vector.load %arg5[%c0_5, %c0_6] : memref<16x256xbf16, #tpu.memory_space<vmem>>, vector<16x256xbf16>
    %c0_7 = arith.constant 0 : index
    %c0_8 = arith.constant 0 : index
    %4 = vector.load %arg6[%c0_7, %c0_8] : memref<8x4xf32, #tpu.memory_space<vmem>>, vector<8x4xf32>
    %5 = arith.truncf %4 : vector<8x4xf32> to vector<8x4xbf16>
    %c0_9 = arith.constant 0 : index
    %c0_10 = arith.constant 0 : index
    %6 = vector.load %arg8[%c0_9, %c0_10] : memref<4x8xf32, #tpu.memory_space<vmem>>, vector<4x8xf32>
    %7 = arith.truncf %6 : vector<4x8xf32> to vector<4x8xbf16>
    %c0_11 = arith.constant 0 : index
    %c0_12 = arith.constant 0 : index
    %8 = vector.load %arg10[%c0_11, %c0_12] : memref<4x8xf32, #tpu.memory_space<vmem>>, vector<4x8xf32>
    %9 = arith.truncf %8 : vector<4x8xf32> to vector<4x8xbf16>
    %c0_13 = arith.constant 0 : index
    %c0_14 = arith.constant 0 : index
    %10 = vector.load %arg7[%c0_13, %c0_14] : memref<8x1xf32, #tpu.memory_space<vmem>>, vector<8x1xf32>
    %11 = vector.shape_cast %10 : vector<8x1xf32> to vector<8x1xf32>
    %12 = vector.broadcast %11 : vector<8x1xf32> to vector<8x32xf32>
    %c0_15 = arith.constant 0 : index
    %c0_16 = arith.constant 0 : index
    %13 = vector.load %arg9[%c0_15, %c0_16] : memref<4x1xf32, #tpu.memory_space<vmem>>, vector<4x1xf32>
    %14 = vector.shape_cast %13 : vector<4x1xf32> to vector<4x1xf32>
    %15 = vector.broadcast %14 : vector<4x1xf32> to vector<4x16xf32>
    %c0_17 = arith.constant 0 : index
    %c0_18 = arith.constant 0 : index
    %16 = vector.load %arg11[%c0_17, %c0_18] : memref<4x1xf32, #tpu.memory_space<vmem>>, vector<4x1xf32>
    %17 = vector.shape_cast %16 : vector<4x1xf32> to vector<4x1xf32>
    %18 = vector.broadcast %17 : vector<4x1xf32> to vector<4x16xf32>
    %c0_19 = arith.constant 0 : index
    %c0_20 = arith.constant 0 : index
    %c0_21 = arith.constant 0 : index
    %19 = vector.load %arg1[%c0_19, %c0_20, %c0_21] : memref<1x4x256xf32, #tpu.memory_space<vmem>>, vector<1x4x256xf32>
    %20 = vector.shape_cast %19 : vector<1x4x256xf32> to vector<4x256xf32>
    %21 = arith.truncf %20 : vector<4x256xf32> to vector<4x256xbf16>
    %cst = arith.constant dense<0.000000e+00> : vector<4x32xf32>
    %22 = tpu.matmul %21, %0, %cst {dimension_numbers = #tpu.dot_dimension_numbers<[1], [0], [0], [1], [0, 0, 1, 1], [], []>} : vector<4x256xbf16>, vector<256x32xbf16>, vector<4x32xf32> -> vector<4x32xf32>
    %23 = vector.broadcast %1 : vector<1x32xf32> to vector<4x32xf32>
    %24 = arith.mulf %22, %23 : vector<4x32xf32>
    %25 = arith.truncf %24 : vector<4x32xf32> to vector<4x32xbf16>
    %cst_22 = arith.constant dense<0.000000e+00> : vector<8x32xf32>
    %26 = tpu.matmul %5, %25, %cst_22 {dimension_numbers = #tpu.dot_dimension_numbers<[1], [0], [0], [1], [0, 0, 1, 1], [], []>} : vector<8x4xbf16>, vector<4x32xbf16>, vector<8x32xf32> -> vector<8x32xf32>
    %27 = arith.addf %26, %12 : vector<8x32xf32>
    %cst_23 = arith.constant 3.000000e+00 : f32
    %28 = vector.broadcast %cst_23 : f32 to vector<8x32xf32>
    %29 = arith.addf %27, %28 : vector<8x32xf32>
    %cst_24 = arith.constant 0.000000e+00 : f32
    %cst_25 = arith.constant 6.000000e+00 : f32
    %30 = vector.broadcast %cst_24 : f32 to vector<8x32xf32>
    %31 = arith.maximumf %30, %29 : vector<8x32xf32>
    %32 = vector.broadcast %cst_25 : f32 to vector<8x32xf32>
    %33 = arith.minimumf %32, %31 : vector<8x32xf32>
    %34 = arith.mulf %27, %33 : vector<8x32xf32>
    %cst_26 = arith.constant 0.166666672 : f32
    %35 = vector.broadcast %cst_26 : f32 to vector<8x32xf32>
    %36 = arith.mulf %34, %35 : vector<8x32xf32>
    %37 = vector.extract_strided_slice %36 {offsets = [0, 0], sizes = [8, 16], strides = [1, 1]} : vector<8x32xf32> to vector<8x16xf32>
    %38 = vector.extract_strided_slice %36 {offsets = [0, 16], sizes = [8, 16], strides = [1, 1]} : vector<8x32xf32> to vector<8x16xf32>
    %39 = arith.truncf %37 : vector<8x16xf32> to vector<8x16xbf16>
    %cst_27 = arith.constant dense<0.000000e+00> : vector<4x16xf32>
    %40 = tpu.matmul %7, %39, %cst_27 {dimension_numbers = #tpu.dot_dimension_numbers<[1], [0], [0], [1], [0, 0, 1, 1], [], []>} : vector<4x8xbf16>, vector<8x16xbf16>, vector<4x16xf32> -> vector<4x16xf32>
    %41 = arith.addf %40, %15 : vector<4x16xf32>
    %42 = arith.negf %41 : vector<4x16xf32>
    %43 = math.exp %42 : vector<4x16xf32>
    %cst_28 = arith.constant 1.000000e+00 : f32
    %44 = vector.broadcast %cst_28 : f32 to vector<4x16xf32>
    %45 = arith.addf %44, %43 : vector<4x16xf32>
    %46 = arith.divf %44, %45 : vector<4x16xf32>
    %47 = arith.truncf %38 : vector<8x16xf32> to vector<8x16xbf16>
    %cst_29 = arith.constant dense<0.000000e+00> : vector<4x16xf32>
    %48 = tpu.matmul %9, %47, %cst_29 {dimension_numbers = #tpu.dot_dimension_numbers<[1], [0], [0], [1], [0, 0, 1, 1], [], []>} : vector<4x8xbf16>, vector<8x16xbf16>, vector<4x16xf32> -> vector<4x16xf32>
    %49 = arith.addf %48, %18 : vector<4x16xf32>
    %50 = arith.negf %49 : vector<4x16xf32>
    %51 = math.exp %50 : vector<4x16xf32>
    %cst_30 = arith.constant 1.000000e+00 : f32
    %52 = vector.broadcast %cst_30 : f32 to vector<4x16xf32>
    %53 = arith.addf %52, %51 : vector<4x16xf32>
    %54 = arith.divf %52, %53 : vector<4x16xf32>
    %55 = arith.truncf %46 : vector<4x16xf32> to vector<4x16xbf16>
    %cst_31 = arith.constant dense<0.000000e+00> : vector<4x256xf32>
    %56 = tpu.matmul %55, %2, %cst_31 {dimension_numbers = #tpu.dot_dimension_numbers<[1], [0], [0], [1], [0, 0, 1, 1], [], []>} : vector<4x16xbf16>, vector<16x256xbf16>, vector<4x256xf32> -> vector<4x256xf32>
    %57 = arith.truncf %54 : vector<4x16xf32> to vector<4x16xbf16>
    %cst_32 = arith.constant dense<0.000000e+00> : vector<4x256xf32>
    %58 = tpu.matmul %57, %3, %cst_32 {dimension_numbers = #tpu.dot_dimension_numbers<[1], [0], [0], [1], [0, 0, 1, 1], [], []>} : vector<4x16xbf16>, vector<16x256xbf16>, vector<4x256xf32> -> vector<4x256xf32>
    %59 = arith.mulf %56, %58 : vector<4x256xf32>
    %c0_33 = arith.constant 0 : index
    %c0_34 = arith.constant 0 : index
    %c0_35 = arith.constant 0 : index
    %60 = vector.load %arg12[%c0_33, %c0_34, %c0_35] : memref<1x4x256xf32, #tpu.memory_space<vmem>>, vector<1x4x256xf32>
    %61 = vector.shape_cast %60 : vector<1x4x256xf32> to vector<4x256xf32>
    %62 = vector.shape_cast %59 : vector<4x256xf32> to vector<1x4x256xf32>
    tpu.vector_store %arg12[%c0_33, %c0_34, %c0_35], %62 {strides = array<i32>} : memref<1x4x256xf32, #tpu.memory_space<vmem>>, vector<1x4x256xf32>,
    return
  }
  func.func @transform_0(%arg0: i32) -> (i32, i32, i32) {
    %c0_i32 = arith.constant 0 : i32
    %c0_i32_0 = arith.constant 0 : i32
    %c0_i32_1 = arith.constant 0 : i32
    return %arg0, %c0_i32, %c0_i32_0 : i32, i32, i32
  }
  func.func @transform_1(%arg0: i32) -> (i32, i32) {
    %c0_i32 = arith.constant 0 : i32
    %c0_i32_0 = arith.constant 0 : i32
    %c0_i32_1 = arith.constant 0 : i32
    return %c0_i32, %c0_i32_0 : i32, i32
  }
  func.func @transform_2(%arg0: i32) -> (i32, i32) {
    %c0_i32 = arith.constant 0 : i32
    %c0_i32_0 = arith.constant 0 : i32
    %c0_i32_1 = arith.constant 0 : i32
    return %c0_i32, %c0_i32_0 : i32, i32
  }
  func.func @transform_3(%arg0: i32) -> (i32, i32) {
    %c0_i32 = arith.constant 0 : i32
    %c0_i32_0 = arith.constant 0 : i32
    %c0_i32_1 = arith.constant 0 : i32
    return %c0_i32, %c0_i32_0 : i32, i32
  }
  func.func @transform_4(%arg0: i32) -> (i32, i32) {
    %c0_i32 = arith.constant 0 : i32
    %c0_i32_0 = arith.constant 0 : i32
    %c0_i32_1 = arith.constant 0 : i32
    return %c0_i32, %c0_i32_0 : i32, i32
  }
  func.func @transform_5(%arg0: i32) -> (i32, i32) {
    %c0_i32 = arith.constant 0 : i32
    %c0_i32_0 = arith.constant 0 : i32
    %c0_i32_1 = arith.constant 0 : i32
    return %c0_i32, %c0_i32_0 : i32, i32
  }
  func.func @transform_6(%arg0: i32) -> (i32, i32) {
    %c0_i32 = arith.constant 0 : i32
    %c0_i32_0 = arith.constant 0 : i32
    %c0_i32_1 = arith.constant 0 : i32
    return %c0_i32, %c0_i32_0 : i32, i32
  }
  func.func @transform_7(%arg0: i32) -> (i32, i32) {
    %c0_i32 = arith.constant 0 : i32
    %c0_i32_0 = arith.constant 0 : i32
    %c0_i32_1 = arith.constant 0 : i32
    return %c0_i32, %c0_i32_0 : i32, i32
  }
  func.func @transform_8(%arg0: i32) -> (i32, i32) {
    %c0_i32 = arith.constant 0 : i32
    %c0_i32_0 = arith.constant 0 : i32
    %c0_i32_1 = arith.constant 0 : i32
    return %c0_i32, %c0_i32_0 : i32, i32
  }
  func.func @transform_9(%arg0: i32) -> (i32, i32) {
    %c0_i32 = arith.constant 0 : i32
    %c0_i32_0 = arith.constant 0 : i32
    %c0_i32_1 = arith.constant 0 : i32
    return %c0_i32, %c0_i32_0 : i32, i32
  }
  func.func @transform_10(%arg0: i32) -> (i32, i32) {
    %c0_i32 = arith.constant 0 : i32
    %c0_i32_0 = arith.constant 0 : i32
    %c0_i32_1 = arith.constant 0 : i32
    return %c0_i32, %c0_i32_0 : i32, i32
  }
  func.func @transform_11(%arg0: i32) -> (i32, i32, i32) {
    %c0_i32 = arith.constant 0 : i32
    %c0_i32_0 = arith.constant 0 : i32
    %c0_i32_1 = arith.constant 0 : i32
    return %arg0, %c0_i32, %c0_i32_0 : i32, i32, i32
  }
}

module attributes {stable_mosaic.version = 11 : i64} {
  func.func @_coordatt_kernel(%arg0: i32, %arg1: memref<1x4x256xf32, #tpu.memory_space<vmem>>, %arg2: memref<256x32xbf16, #tpu.memory_space<vmem>>, %arg3: memref<1x32xf32, #tpu.memory_space<vmem>>, %arg4: memref<16x256xbf16, #tpu.memory_space<vmem>>, %arg5: memref<16x256xbf16, #tpu.memory_space<vmem>>, %arg6: memref<8x4xf32, #tpu.memory_space<vmem>>, %arg7: memref<8x1xf32, #tpu.memory_space<vmem>>, %arg8: memref<4x8xf32, #tpu.memory_space<vmem>>, %arg9: memref<4x1xf32, #tpu.memory_space<vmem>>, %arg10: memref<4x8xf32, #tpu.memory_space<vmem>>, %arg11: memref<4x1xf32, #tpu.memory_space<vmem>>, %arg12: memref<1x4x256xf32, #tpu.memory_space<vmem>>) attributes {dimension_semantics = [#tpu.dimension_semantics<parallel>], iteration_bounds = array<i64: 2>, scalar_prefetch = 0 : i64, scratch_operands = 0 : i64, tpu.core_type = #tpu.core_type<tc>, window_params = [{transform_indices = @transform_0, window_bounds = array<i64: 1, 4, 256>}, {pipeline_mode = #tpu.pipeline_mode<synchronous>, transform_indices = @transform_1, window_bounds = array<i64: 256, 32>}, {pipeline_mode = #tpu.pipeline_mode<synchronous>, transform_indices = @transform_2, window_bounds = array<i64: 1, 32>}, {pipeline_mode = #tpu.pipeline_mode<synchronous>, transform_indices = @transform_3, window_bounds = array<i64: 16, 256>}, {pipeline_mode = #tpu.pipeline_mode<synchronous>, transform_indices = @transform_4, window_bounds = array<i64: 16, 256>}, {pipeline_mode = #tpu.pipeline_mode<synchronous>, transform_indices = @transform_5, window_bounds = array<i64: 8, 4>}, {pipeline_mode = #tpu.pipeline_mode<synchronous>, transform_indices = @transform_6, window_bounds = array<i64: 8, 1>}, {pipeline_mode = #tpu.pipeline_mode<synchronous>, transform_indices = @transform_7, window_bounds = array<i64: 4, 8>}, {pipeline_mode = #tpu.pipeline_mode<synchronous>, transform_indices = @transform_8, window_bounds = array<i64: 4, 1>}, {pipeline_mode = #tpu.pipeline_mode<synchronous>, transform_indices = @transform_9, window_bounds = array<i64: 4, 8>}, {pipeline_mode = #tpu.pipeline_mode<synchronous>, transform_indices = @transform_10, window_bounds = array<i64: 4, 1>}, {transform_indices = @transform_11, window_bounds = array<i64: 1, 4, 256>}]} {
    %c0 = arith.constant 0 : index
    %c0_0 = arith.constant 0 : index
    %0 = vector.load %arg2[%c0, %c0_0] : memref<256x32xbf16, #tpu.memory_space<vmem>>, vector<256x32xbf16>
    %c0_1 = arith.constant 0 : index
    %c0_2 = arith.constant 0 : index
    %1 = vector.load %arg3[%c0_1, %c0_2] : memref<1x32xf32, #tpu.memory_space<vmem>>, vector<1x32xf32>
    %c0_3 = arith.constant 0 : index
    %c0_4 = arith.constant 0 : index
    %2 = vector.load %arg4[%c0_3, %c0_4] : memref<16x256xbf16, #tpu.memory_space<vmem>>, vector<16x256xbf16>
    %c0_5 = arith.constant 0 : index
    %c0_6 = arith.constant 0 : index
    %3 = vector.load %arg5[%c0_5, %c0_6] : memref<16x256xbf16, #tpu.memory_space<vmem>>, vector<16x256xbf16>
    %c0_7 = arith.constant 0 : index
    %c0_8 = arith.constant 0 : index
    %4 = vector.load %arg6[%c0_7, %c0_8] : memref<8x4xf32, #tpu.memory_space<vmem>>, vector<8x4xf32>
    %5 = arith.truncf %4 : vector<8x4xf32> to vector<8x4xbf16>
    %c0_9 = arith.constant 0 : index
    %c0_10 = arith.constant 0 : index
    %6 = vector.load %arg8[%c0_9, %c0_10] : memref<4x8xf32, #tpu.memory_space<vmem>>, vector<4x8xf32>
    %7 = arith.truncf %6 : vector<4x8xf32> to vector<4x8xbf16>
    %c0_11 = arith.constant 0 : index
    %c0_12 = arith.constant 0 : index
    %8 = vector.load %arg10[%c0_11, %c0_12] : memref<4x8xf32, #tpu.memory_space<vmem>>, vector<4x8xf32>
    %9 = arith.truncf %8 : vector<4x8xf32> to vector<4x8xbf16>
    %c0_13 = arith.constant 0 : index
    %c0_14 = arith.constant 0 : index
    %10 = vector.load %arg7[%c0_13, %c0_14] : memref<8x1xf32, #tpu.memory_space<vmem>>, vector<8x1xf32>
    %11 = vector.shape_cast %10 : vector<8x1xf32> to vector<8x1xf32>
    %12 = vector.broadcast %11 : vector<8x1xf32> to vector<8x32xf32>
    %c0_15 = arith.constant 0 : index
    %c0_16 = arith.constant 0 : index
    %13 = vector.load %arg9[%c0_15, %c0_16] : memref<4x1xf32, #tpu.memory_space<vmem>>, vector<4x1xf32>
    %14 = vector.shape_cast %13 : vector<4x1xf32> to vector<4x1xf32>
    %15 = vector.broadcast %14 : vector<4x1xf32> to vector<4x16xf32>
    %c0_17 = arith.constant 0 : index
    %c0_18 = arith.constant 0 : index
    %16 = vector.load %arg11[%c0_17, %c0_18] : memref<4x1xf32, #tpu.memory_space<vmem>>, vector<4x1xf32>
    %17 = vector.shape_cast %16 : vector<4x1xf32> to vector<4x1xf32>
    %18 = vector.broadcast %17 : vector<4x1xf32> to vector<4x16xf32>
    %c0_19 = arith.constant 0 : index
    %c0_20 = arith.constant 0 : index
    %c0_21 = arith.constant 0 : index
    %19 = vector.load %arg1[%c0_19, %c0_20, %c0_21] : memref<1x4x256xf32, #tpu.memory_space<vmem>>, vector<1x4x256xf32>
    %20 = vector.shape_cast %19 : vector<1x4x256xf32> to vector<4x256xf32>
    %21 = arith.truncf %20 : vector<4x256xf32> to vector<4x256xbf16>
    %cst = arith.constant dense<0.000000e+00> : vector<4x32xf32>
    %22 = tpu.matmul %21, %0, %cst {dimension_numbers = #tpu.dot_dimension_numbers<[1], [0], [0], [1], [0, 0, 1, 1], [], []>} : vector<4x256xbf16>, vector<256x32xbf16>, vector<4x32xf32> -> vector<4x32xf32>
    %23 = vector.broadcast %1 : vector<1x32xf32> to vector<4x32xf32>
    %24 = arith.mulf %22, %23 : vector<4x32xf32>
    %25 = arith.truncf %24 : vector<4x32xf32> to vector<4x32xbf16>
    %cst_22 = arith.constant dense<0.000000e+00> : vector<8x32xf32>
    %26 = tpu.matmul %5, %25, %cst_22 {dimension_numbers = #tpu.dot_dimension_numbers<[1], [0], [0], [1], [0, 0, 1, 1], [], []>} : vector<8x4xbf16>, vector<4x32xbf16>, vector<8x32xf32> -> vector<8x32xf32>
    %27 = arith.addf %26, %12 : vector<8x32xf32>
    %cst_23 = arith.constant 3.000000e+00 : f32
    %28 = vector.broadcast %cst_23 : f32 to vector<8x32xf32>
    %29 = arith.addf %27, %28 : vector<8x32xf32>
    %cst_24 = arith.constant 0.000000e+00 : f32
    %cst_25 = arith.constant 6.000000e+00 : f32
    %30 = vector.broadcast %cst_24 : f32 to vector<8x32xf32>
    %31 = arith.maximumf %30, %29 : vector<8x32xf32>
    %32 = vector.broadcast %cst_25 : f32 to vector<8x32xf32>
    %33 = arith.minimumf %32, %31 : vector<8x32xf32>
    %34 = arith.mulf %27, %33 : vector<8x32xf32>
    %cst_26 = arith.constant 0.166666672 : f32
    %35 = vector.broadcast %cst_26 : f32 to vector<8x32xf32>
    %36 = arith.mulf %34, %35 : vector<8x32xf32>
    %37 = vector.extract_strided_slice %36 {offsets = [0, 0], sizes = [8, 16], strides = [1, 1]} : vector<8x32xf32> to vector<8x16xf32>
    %38 = vector.extract_strided_slice %36 {offsets = [0, 16], sizes = [8, 16], strides = [1, 1]} : vector<8x32xf32> to vector<8x16xf32>
    %39 = arith.truncf %37 : vector<8x16xf32> to vector<8x16xbf16>
    %cst_27 = arith.constant dense<0.000000e+00> : vector<4x16xf32>
    %40 = tpu.matmul %7, %39, %cst_27 {dimension_numbers = #tpu.dot_dimension_numbers<[1], [0], [0], [1], [0, 0, 1, 1], [], []>} : vector<4x8xbf16>, vector<8x16xbf16>, vector<4x16xf32> -> vector<4x16xf32>
    %41 = arith.addf %40, %15 : vector<4x16xf32>
    %42 = arith.negf %41 : vector<4x16xf32>
    %43 = math.exp %42 : vector<4x16xf32>
    %cst_28 = arith.constant 1.000000e+00 : f32
    %44 = vector.broadcast %cst_28 : f32 to vector<4x16xf32>
    %45 = arith.addf %44, %43 : vector<4x16xf32>
    %46 = arith.divf %44, %45 : vector<4x16xf32>
    %47 = arith.truncf %38 : vector<8x16xf32> to vector<8x16xbf16>
    %cst_29 = arith.constant dense<0.000000e+00> : vector<4x16xf32>
    %48 = tpu.matmul %9, %47, %cst_29 {dimension_numbers = #tpu.dot_dimension_numbers<[1], [0], [0], [1], [0, 0, 1, 1], [], []>} : vector<4x8xbf16>, vector<8x16xbf16>, vector<4x16xf32> -> vector<4x16xf32>
    %49 = arith.addf %48, %18 : vector<4x16xf32>
    %50 = arith.negf %49 : vector<4x16xf32>
    %51 = math.exp %50 : vector<4x16xf32>
    %cst_30 = arith.constant 1.000000e+00 : f32
    %52 = vector.broadcast %cst_30 : f32 to vector<4x16xf32>
    %53 = arith.addf %52, %51 : vector<4x16xf32>
    %54 = arith.divf %52, %53 : vector<4x16xf32>
    %55 = arith.truncf %46 : vector<4x16xf32> to vector<4x16xbf16>
    %cst_31 = arith.constant dense<0.000000e+00> : vector<4x256xf32>
    %56 = tpu.matmul %55, %2, %cst_31 {dimension_numbers = #tpu.dot_dimension_numbers<[1], [0], [0], [1], [0, 0, 1, 1], [], []>} : vector<4x16xbf16>, vector<16x256xbf16>, vector<4x256xf32> -> vector<4x256xf32>
    %57 = arith.truncf %54 : vector<4x16xf32> to vector<4x16xbf16>
    %cst_32 = arith.constant dense<0.000000e+00> : vector<4x256xf32>
    %58 = tpu.matmul %57, %3, %cst_32 {dimension_numbers = #tpu.dot_dimension_numbers<[1], [0], [0], [1], [0, 0, 1, 1], [], []>} : vector<4x16xbf16>, vector<16x256xbf16>, vector<4x256xf32> -> vector<4x256xf32>
    %59 = arith.mulf %56, %58 : vector<4x256xf32>
    %c0_33 = arith.constant 0 : index
    %c0_34 = arith.constant 0 : index
    %c0_35 = arith.constant 0 : index
    %60 = vector.load %arg12[%c0_33, %c0_34, %c0_35] : memref<1x4x256xf32, #tpu.memory_space<vmem>>, vector<1x4x256xf32>
    %61 = vector.shape_cast %60 : vector<1x4x256xf32> to vector<4x256xf32>
    %62 = vector.shape_cast %59 : vector<4x256xf32> to vector<1x4x256xf32>
    tpu.vector_store %arg12[%c0_33, %c0_34, %c0_35], %62 {strides = array<i32>} : memref<1x4x256xf32, #tpu.memory_space<vmem>>, vector<1x4x256xf32>,
    return
  }
  func.func @transform_0(%arg0: i32) -> (i32, i32, i32) {
    %c0_i32 = arith.constant 0 : i32
    %c0_i32_0 = arith.constant 0 : i32
    %c0_i32_1 = arith.constant 0 : i32
    return %arg0, %c0_i32, %c0_i32_0 : i32, i32, i32
  }
  func.func @transform_1(%arg0: i32) -> (i32, i32) {
    %c0_i32 = arith.constant 0 : i32
    %c0_i32_0 = arith.constant 0 : i32
    %c0_i32_1 = arith.constant 0 : i32
    return %c0_i32, %c0_i32_0 : i32, i32
  }
  func.func @transform_2(%arg0: i32) -> (i32, i32) {
    %c0_i32 = arith.constant 0 : i32
    %c0_i32_0 = arith.constant 0 : i32
    %c0_i32_1 = arith.constant 0 : i32
    return %c0_i32, %c0_i32_0 : i32, i32
  }
  func.func @transform_3(%arg0: i32) -> (i32, i32) {
    %c0_i32 = arith.constant 0 : i32
    %c0_i32_0 = arith.constant 0 : i32
    %c0_i32_1 = arith.constant 0 : i32
    return %c0_i32, %c0_i32_0 : i32, i32
  }
  func.func @transform_4(%arg0: i32) -> (i32, i32) {
    %c0_i32 = arith.constant 0 : i32
    %c0_i32_0 = arith.constant 0 : i32
    %c0_i32_1 = arith.constant 0 : i32
    return %c0_i32, %c0_i32_0 : i32, i32
  }
  func.func @transform_5(%arg0: i32) -> (i32, i32) {
    %c0_i32 = arith.constant 0 : i32
    %c0_i32_0 = arith.constant 0 : i32
    %c0_i32_1 = arith.constant 0 : i32
    return %c0_i32, %c0_i32_0 : i32, i32
  }
  func.func @transform_6(%arg0: i32) -> (i32, i32) {
    %c0_i32 = arith.constant 0 : i32
    %c0_i32_0 = arith.constant 0 : i32
    %c0_i32_1 = arith.constant 0 : i32
    return %c0_i32, %c0_i32_0 : i32, i32
  }
  func.func @transform_7(%arg0: i32) -> (i32, i32) {
    %c0_i32 = arith.constant 0 : i32
    %c0_i32_0 = arith.constant 0 : i32
    %c0_i32_1 = arith.constant 0 : i32
    return %c0_i32, %c0_i32_0 : i32, i32
  }
  func.func @transform_8(%arg0: i32) -> (i32, i32) {
    %c0_i32 = arith.constant 0 : i32
    %c0_i32_0 = arith.constant 0 : i32
    %c0_i32_1 = arith.constant 0 : i32
    return %c0_i32, %c0_i32_0 : i32, i32
  }
  func.func @transform_9(%arg0: i32) -> (i32, i32) {
    %c0_i32 = arith.constant 0 : i32
    %c0_i32_0 = arith.constant 0 : i32
    %c0_i32_1 = arith.constant 0 : i32
    return %c0_i32, %c0_i32_0 : i32, i32
  }
  func.func @transform_10(%arg0: i32) -> (i32, i32) {
    %c0_i32 = arith.constant 0 : i32
    %c0_i32_0 = arith.constant 0 : i32
    %c0_i32_1 = arith.constant 0 : i32
    return %c0_i32, %c0_i32_0 : i32, i32
  }
  func.func @transform_11(%arg0: i32) -> (i32, i32, i32) {
    %c0_i32 = arith.constant 0 : i32
    %c0_i32_0 = arith.constant 0 : i32
    %c0_i32_1 = arith.constant 0 : i32
    return %arg0, %c0_i32, %c0_i32_0 : i32, i32, i32
  }
}

</mosaic_0001>

<bundles_post_ra>
// kernel: tpu_custom_call.1
= control target key start
LH: loop header
LB: loop body
LE: loop exit
PB: predicated region body
PF: predicated region fallthrough
CT: control target
= control target key end

     0   :  { %16 = vsyncpa [#allocation3], 0  ;;  %s1426_s0 = inlined_call_operand.vmem [shape: f32[2,4,256], index: 0, kind: input, shape index: {}]   ;;  %s1427_s1 = inlined_call_operand.vmem [shape: bf16[256,32], index: 1, kind: input, shape index: {}]   ;;  %s1428_s2 = inlined_call_operand.vmem [shape: f32[1,32], index: 2, kind: input, shape index: {}]   ;;  %s1429_s3 = inlined_call_operand.vmem [shape: bf16[16,256], index: 3, kind: input, shape index: {}]   ;;  %s1430_s4 = inlined_call_operand.vmem [shape: bf16[16,256], index: 4, kind: input, shape index: {}]   ;;  %s1431_s5 = inlined_call_operand.vmem [shape: f32[8,4], index: 5, kind: input, shape index: {}]   ;;  %s1432_s6 = inlined_call_operand.vmem [shape: f32[8,1], index: 6, kind: input, shape index: {}]   ;;  %s1433_s7 = inlined_call_operand.vmem [shape: f32[4,8], index: 7, kind: input, shape index: {}]   ;;  %s1434_s8 = inlined_call_operand.vmem [shape: f32[4,1], index: 8, kind: input, shape index: {}]   ;;  %s1435_s9 = inlined_call_operand.vmem [shape: f32[4,8], index: 9, kind: input, shape index: {}]   ;;  %s1436_s10 = inlined_call_operand.vmem [shape: f32[4,1], index: 10, kind: input, shape index: {}]   ;;  %s1437_s11 = inlined_call_operand.hbm [shape: f32[2,4,256], index: 11, kind: output, shape index: {}]  }
   0x1   :  { %18 = vsyncpa [#allocation3 + $0x1], 0  ;;  %s1243_s17 = smov 0   ;;  %s1245_s18 = smov 0  }
   0x2   :  { %s1247_s19 = smov 0   ;;  %s1249_s20 = smov 0  }
   0x3 LB: > { %1441 = sst [smem:[#allocation5_spill]] %s1172_s19  ;;  %s1264_s21 = sadd.s32 4294967295, %s1176_s20   ;;  %s1176_s20 = sphi %s1249_s20, %s1446_s20   ;;  %s1172_s19 = sphi %s1247_s19, %s1448_s19   ;;  %s1168_s18 = sphi %s1245_s18, %s1450_s18   ;;  %s1164_s17 = sphi %s1243_s17, %s1449_s17  }
   0x4   : > { %s952_s22 = sadd.s32 4294967294, %s1176_s20   ;;  %s1268_s23 = sadd.s32 1, %s1176_s20  }
   0x5   : > { %1442 = sst [smem:[#allocation6_spill]] %s1268_s23  ;;  %s267_s24 = sadd.s32 1, %s1172_s19 }
   0x6   : > { %s264_s25 = ssub.s32 %s1176_s20, %s1268_s23  ;;  %p277_p0 = scmp.ne.s32.totalorder %s1172_s19, %s1168_s18 }
   0x7   : > { %p265_p1 = scmp.eq.s32.totalorder %s264_s25, 0  ;;  %p278_p2 = scmp.eq.s32.totalorder %s1264_s21, 1 }
   0x8   : > { %p283_p3 = scmp.ne.s32.totalorder %s1168_s18, %s1164_s17  ;;  %p284_p4 = scmp.eq.s32.totalorder %s952_s22, 1 }
   0x9   : > { %s1279_s26 = scalar_select %p265_p1, %s1172_s19, %s267_s24  }
   0xa   : > { %p1281_p5 = por %p278_p2, %p277_p0  ;;  %p1285_p6 = por %p284_p4, %p283_p3 }
   0xb   : > { %1443 = sst [smem:[#allocation7_spill]] %s1279_s26  ;;  %p955_p7 = scmp.ge.s32.totalorder %s1176_s20, 1 }
   0xc   : > { %p340_p8 = scmp.lt.s32.totalorder %s1176_s20, 3 }
   0xe   : > { %p341_p9 = pnand %p955_p7, %p340_p8 }
   0xf   : > { %p380_p10 = scmp.lt.s32.totalorder (!%p341_p9), %s1264_s21, 1  ;;  %s377_s24 = sand.u32 (!%p341_p9), 1, %s1168_s18  }
  0x10   : > { %344 = sbr.rel (%p341_p9) target bundleno = 1026 (0x402), region = 64  ;;  %s956_s25 = sshll.u32 (!%p341_p9), %s377_s24, 3 }
  0x11   : > { %s379_s12 = scalar_lea.vmem (!%p341_p9), [#allocation2], %s956_s25  ;;  %s879_s19 = scalar_lea.sflag (!%p341_p9), [#allocation3], %s377_s24 }
  0x15   : > { %v1085_v0 = vld [vmem:[%s1427_s1 + $0x78] sm:$0xff]   ;;  %v1087_v2 = vld [vmem:[%s1427_s1 + $0x70] sm:$0xff]   ;;  %v1089_v4 = vld [vmem:[%s1427_s1 + $0x68] sm:$0xff]   ;;  %s381_s29 = scalar_select %p380_p10, %s1264_s21, 1  ;;  %v1178_v20 = vmov 0.0   ;;  %vm1179_vm0 = vmmov 0  }
  0x16   : > { %v1086_v1 = vld [vmem:[%s1427_s1 + $0x38] sm:$0xff]   ;;  %994 = vmatprep.subr.bf16.mxu0 %v1085_v0  ;;  %v1088_v3 = vld [vmem:[%s1427_s1 + $0x30] sm:$0xff]   ;;  %v1090_v5 = vld [vmem:[%s1427_s1 + $0x28] sm:$0xff]   ;;  %1022 = vmatprep.subr.bf16.mxu1 %v1178_v20  ;;  %v1180_v22 = vmov 0   ;;  %vm601_vm1 = vcmask 1041408   ;;  %vm597_vm2 = vcmask 31744  }
  0x17   : > { %995 = vmatpush3.bf16.msra.mxu0 %v1086_v1  ;;  %v1091_v6 = vld [vmem:[%s1427_s1 + $0x60] sm:$0xff]   ;;  %s992_s15 = sshll.u32 %s381_s29, 3  ;;  %v1093_v8 = vld [vmem:[%s1427_s1 + $0x58] sm:$0xff]   ;;  %v1095_v10 = vld [vmem:[%s1427_s1 + $0x50] sm:$0xff]   ;;  %1024 = vmatprep.mubr.msk.bf16.mxu1 %vm1179_vm0, %v1178_v20  ;;  %vm655_vm3 = vcmask 1043456   ;;  %vm651_vm4 = vcmask 64512  }
  0x18   : > { %996 = vmatprep.subr.bf16.mxu0 %v1087_v2  ;;  %v1092_v7 = vld [vmem:[%s1427_s1 + $0x20] sm:$0xff]   ;;  %s384_s30 = scalar_lea.vmem %s1426_s0, %s992_s15  ;;  %v1094_v9 = vld [vmem:[%s1427_s1 + $0x18] sm:$0xff]   ;;  %v1096_v13 = vld [vmem:[%s1427_s1 + $0x10] sm:$0xff]   ;;  %1083 = vset.pattern.permute.xlu0 %v1180_v22  ;;  %vm771_vm5 = vcmask 130048   ;;  %s893_s29 = sshll.u32 %s379_s12, 4  ;;  %s894_s29 = int_to_ptr.vmem [resolvable:$true] %s893_s29 }
  0x19   : > { %v447_v11 = vld [vmem:[%s384_s30] sm:$0xff]  ;;  %v1097_v15 = vld [vmem:[%s1427_s1 + $0x48] sm:$0xff]   ;;  %1084 = vset.pattern.permute.xlu1 %v1180_v22  ;;  %s1181_s30 = smov 112   ;;  %s1116_s26 = scalar_lea.vmem %s894_s29, 128 }
  0x1a   : > { %v449_v12 = vcombine.high %v447_v11, %v447_v11  ;;  %v1098_v16 = vld [vmem:[%s1427_s1 + $0x8] sm:$0xff]   ;;  %v1099_v17 = vld [vmem:[%s1427_s1 + $0x40] sm:$0xff]   ;;  %v451_v19 = vpack.c.bf16 %v447_v11, %v447_v11  ;;  %p1117_p11 = scmp.ne.s32.totalorder %s894_s29, %s1116_s26 }
  0x1b   : > { %997 = vmatpush3.bf16.msra.mxu0 %v1088_v3  ;;  %v1100_v18 = vld [vmem:[%s1427_s1] sm:$0xff]  }
  0x1c   : > { %998 = vmatprep.subr.bf16.mxu0 %v1089_v4  ;;  %v452_v14 = vpack.c.bf16 %v449_v12, %v449_v12  ;;  %v429_v21 = vld [vmem:[%s1432_s6] sm:$0xff]  ;;  %p1118_p12 = pnand %p1117_p11, %p1281_p5 }
  0x1d   : > { %432 = vperm.xlu0 %1083, %v429_v21   ;;  %v975_v24 = vld [vmem:[%s1428_s2] ss:$0 sm:$0xff]  ;;  %v1104_v61 = vld [vmem:[%s1429_s3 + $0x4] ss:$8 sps:$4 sm:$0xff]  }
  0x1e   : > { %581 = vmatprep.mubr.bf16.mxu0 %v452_v14  ;;  %v423_v30 = vld [vmem:[%s1431_s5] sm:$0xff]  ;;  %p1119_p13 = pneg %p1118_p12 }
  0x1f   : > { %999 = vmatpush3.bf16.msra.mxu0 %v1090_v5  ;;  %v424_v33 = vpack.c.bf16 %v423_v30, %v423_v30  ;;  %v435_v42 = vld [vmem:[%s1434_s8] sm:$0xf]  ;;  %v1107_v1 = vld [vmem:[%s1430_s4 + $0x4] ss:$8 sps:$4 sm:$0xff]  }
  0x20   : > { %1000 = vmatprep.subr.bf16.mxu0 %v1091_v6  ;;  %438 = vperm.xlu1 %1084, %v435_v42   ;;  %v441_v44 = vld [vmem:[%s1436_s10] sm:$0xf] }
  0x21   : > { %v425_v47 = vld [vmem:[%s1433_s7] sm:$0xf] }
  0x22   : > { %v426_v50 = vpack.c.bf16 %v425_v47, %v425_v47  ;;  %v427_v51 = vld [vmem:[%s1435_s9] sm:$0xf] }
  0x23   : > { %1001 = vmatpush3.bf16.msra.mxu0 %v1092_v7  ;;  %v428_v54 = vpack.c.bf16 %v427_v51, %v427_v51  ;;  %v1102_v62 = vld [vmem:[%s1429_s3] ss:$8 sps:$4 sm:$0xff]  }
  0x24   : > { %1002 = vmatprep.subr.bf16.mxu0 %v1093_v8  ;;  %444 = vperm.xlu1 %1084, %v441_v44   ;;  %v1105_v4 = vld [vmem:[%s1430_s4] ss:$8 sps:$4 sm:$0xff]  }
  0x27   : > { %1003 = vmatpush3.bf16.msra.mxu0 %v1094_v9 }
  0x28   : > { %1004 = vmatprep.subr.bf16.mxu0 %v1095_v10 }
  0x2b   : > { %1005 = vmatpush3.bf16.msra.mxu0 %v1096_v13 }
  0x2c   : > { %1006 = vmatprep.subr.bf16.mxu0 %v1097_v15 }
  0x2f   : > { %1007 = vmatpush3.bf16.msra.mxu0 %v1098_v16 }
  0x30   : > { %1008 = vmatprep.subr.bf16.mxu0 %v1099_v17 }
  0x33   : > { %1009 = vmatpush3.bf16.msra.mxu0 %v1100_v18 }
  0x36   : > { %582 = vmatmul.mubr.bf16.vlgmr.msra.gmra.mxu0 %v451_v19 }
  0x98   : > { %v433_v34 = vpop.permute.xlu0 %432 }
  0x9b   : > { %v439_v55 = vpop.permute.xlu1 %438 }
  0x9f   : > { %v445_v6 = vpop.permute.xlu1 %444 }
  0xf6   : > { %v1010_v23 = vpop.f32.mrf.mxu0 }
  0xf8   : > { %v1011_v25 = vpop.f32.mrf.mxu0 }
  0xf9   : > { %v1012_v26 = vadd.f32 %v1011_v25, %v1010_v23 }
  0xfa   : > { %v1013_v27 = vpop.f32.mrf.mxu0 }
  0xfb   : > { %v595_v28 = vmul.f32 %v1012_v26, %v975_v24 }
  0xfc   : > { %v1014_v29 = vpop.f32.mrf.mxu0 }
  0xfd   : > { %v596_v31 = vpack.c.bf16 %v595_v28, %v595_v28 }
  0xff   : > { %v603_v32 = vsel %vm601_vm1, %v596_v31, 0 }
 0x100   : > { %1023 = vmatpush3.bf16.msra.mxu1 %v603_v32 }
 0x101   : > { %1028 = vmatprep.subr.bf16.mxu1 %v1178_v20 }
 0x103   : > { %1025 = vmatmul.mubr.msk.bf16.vlgmr.msra.gmra.mxu1 %vm597_vm2, %v424_v33 }
 0x104   : > { %1030 = vmatprep.mubr.msk.bf16.mxu1 %vm1179_vm0, %v1178_v20 }
 0x1c3   : > { %v639_v35 = vpop.f32.mrf.mxu1 }
 0x1c4   : > { %v640_v36 = vadd.f32 %v639_v35, %v433_v34 }
 0x1c5   : > { %v1026_v37 = vpop.f32.mrf.mxu1 }
 0x1c6   : > { %v645_v38 = vadd.f32 3.0, %v640_v36 }
 0x1c7   : > { %v642_v39 = vpop.f32.mrf.mxu1 }
 0x1c8   : > { %v646_v40 = vmax.f32 %v645_v38, 0.0 }
 0x1c9   : > { %v1027_v41 = vpop.f32.mrf.mxu1 }
 0x1ca   : > { %v647_v43 = vmin.f32 %v646_v40, 6.0 }
 0x1cc   : > { %v648_v45 = vmul.f32 %v647_v43, %v640_v36 }
 0x1ce   : > { %v649_v46 = vmul.f32 0.16666667, %v648_v45 }
 0x1d0   : > { %v650_v48 = vpack.c.bf16 %v649_v46, %v649_v46 }
 0x1d2   : > { %706 = vrot.lane.b32.xlu0 %v650_v48, %s1181_s30  ;;  %v657_v49 = vsel %vm655_vm3, %v650_v48, 0  ;;  %s993_s30 = sshll.u32 %s1264_s21, 7  ;;  %s1182_s21 = smov [#allocation2]  }
 0x1d3   : > { %1029 = vmatpush3.bf16.msra.mxu1 %v657_v49  ;;  %s1391_s16 = scalar_lea.hbm %s1437_s11, %s993_s30  ;;  %s1120_s23 = sshll.u32 %s1182_s21, 4  ;;  %s1121_s23 = int_to_ptr.vmem [resolvable:$false] %s1120_s23 }
 0x1d4   : > { %1034 = vmatprep.subr.bf16.mxu1 %v1178_v20  ;;  %s1122_s15 = scalar_lea.vmem %s1121_s23, 256  ;;  %p1123_p0 = scmp.lt.s32.totalorder %s894_s29, %s1121_s23 }
 0x1d5   : > { %p1124_p1 = scmp.lt.s32.totalorder %s1122_s15, %s1116_s26 }
 0x1d6   : > { %1031 = vmatmul.mubr.msk.bf16.vlgmr.msra.gmra.mxu1 %vm651_vm4, %v426_v50 }
 0x1d7   : > { %1036 = vmatprep.mubr.msk.bf16.mxu1 %vm1179_vm0, %v1178_v20  ;;  %p1125_p2 = por %p1124_p1, %p1123_p0 }
 0x1d9   : > { %p1126_p3 = pnand %p1125_p2, %p1119_p13 }
 0x244   : > { %v707_v52 = vpop.permute.xlu0 %706 }
 0x245   : > { %v712_v53 = vsel %vm655_vm3, %v707_v52, 0 }
 0x246   : > { %1035 = vmatpush3.bf16.msra.mxu1 %v712_v53 }
 0x247   : > { %789 = vmatprep.subr.bf16.mxu1 %v1104_v61 }
 0x249   : > { %1037 = vmatmul.mubr.msk.bf16.vlgmr.msra.gmra.mxu1 %vm651_vm4, %v428_v54 }
 0x24a   : > { %807 = vmatprep.mubr.bf16.mxu1 %v1180_v22  ;;  %790 = vmatpush1.bf16.msra.mxu1 %v1102_v62 }
 0x24b   : > { %844 = vmatprep.subr.bf16.mxu1 %v1107_v1 }
 0x296   : > { %v693_v56 = vpop.f32.mrf.mxu1 }
 0x297   : > { %v694_v57 = vadd.f32 %v693_v56, %v439_v55 }
 0x298   : > { %v1032_v58 = vpop.f32.mrf.mxu1 }
 0x299   : > { %v978_v59 = vmul.f32 -1.442695, %v694_v57 }
 0x29a   : > { %v696_v60 = vpop.f32.mrf.mxu1 }
 0x29b   : > { %1108 = vpow2.f32 %v978_v59 }
 0x29c   : > { %v1033_v63 = vpop.f32.mrf.mxu1 }
 0x2a8   : > { %v1109_v0 = vpop.eup %1108 }
 0x2a9   : > { %v702_v2 = vadd.f32 1.0, %v1109_v0 }
 0x2ab   : > { %1110 = vrcp.f32 %v702_v2 }
 0x2b8   : > { %v1111_v3 = vpop.eup %1110 }
 0x2b9   : > { %v760_v5 = vpack.c.bf16 %v1111_v3, %v1111_v3 }
 0x2bb   : > { %983 = vmatmul.mubr.msk.bf16.vlgmr.msra.gmra.mxu1 %vm771_vm5, %v760_v5 }
 0x2bc   : > { %845 = vmatpush1.bf16.msra.mxu1 %v1105_v4  ;;  %862 = vmatprep.mubr.bf16.mxu1 %v1180_v22 }
 0x309   : > { %v748_v7 = vpop.f32.mrf.mxu1 }
 0x30a   : > { %v749_v8 = vadd.f32 %v748_v7, %v445_v6 }
 0x30b   : > { %v1038_v9 = vpop.f32.mrf.mxu1 }
 0x30c   : > { %v980_v10 = vmul.f32 -1.442695, %v749_v8 }
 0x30d   : > { %v751_v11 = vpop.f32.mrf.mxu1 }
 0x30e   : > { %1112 = vpow2.f32 %v980_v10 }
 0x30f   : > { %v1039_v12 = vpop.f32.mrf.mxu1 }
 0x31b   : > { %v1113_v13 = vpop.eup %1112 }
 0x31c   : > { %v757_v14 = vadd.f32 1.0, %v1113_v13 }
 0x31e   : > { %1114 = vrcp.f32 %v757_v14 }
 0x32b   : > { %v1115_v15 = vpop.eup %1114 }
 0x32c   : > { %v816_v16 = vpack.c.bf16 %v1115_v15, %v1115_v15 }
 0x32e   : > { %986 = vmatmul.mubr.msk.bf16.vlgmr.msra.gmra.mxu1 %vm771_vm5, %v816_v16 }
 0x37b   : > { %v809_v17 = vpop.f32.mrf.mxu1 }
 0x37d   : > { %v811_v18 = vpop.f32.mrf.mxu1 }
 0x37f   : > { %v813_v19 = vpop.f32.mrf.mxu1 }
 0x381   : > { %v814_v20 = vpop.f32.mrf.mxu1 }
 0x3ee   : > { %v864_v21 = vpop.f32.mrf.mxu1 }
 0x3ef   : > { %v871_v23 = vmul.f32 %v864_v21, %v809_v17 }
 0x3f0   : > { %v866_v22 = vpop.f32.mrf.mxu1 }
 0x3f1   : > { %v872_v24 = vmul.f32 %v866_v22, %v811_v18 }
 0x3f2   : > { %v868_v25 = vpop.f32.mrf.mxu1 }
 0x3f3   : > { %v875_v26 = vcombine.low %v871_v23, %v872_v24 }
 0x3f4   : > { %v869_v27 = vpop.f32.mrf.mxu1 }
 0x3f5   : > { %877 = vst [vmem:[%s379_s12] sm:$0xff] %v875_v26 }
 0x3f6   : > { %1129 = shalt.err (!%p1126_p3)
}
 0x3f7   : > { %s1130_s22 = scalar_lea.hbm %s1391_s16, 128  ;;  %s1134_s30 = scalar_lea.hbm %s1437_s11, 256 }
 0x3f8   : > { %p1131_p4 = scmp.ne.s32.totalorder %s1391_s16, %s1130_s22  ;;  %p1135_p9 = scmp.lt.s32.totalorder %s1391_s16, %s1437_s11 }
 0x3f9   : > { %p1136_p10 = scmp.lt.s32.totalorder %s1134_s30, %s1130_s22 }
 0x3fa   : > { %p1132_p7 = pnand %p1131_p4, %p1281_p5 }
 0x3fb   : > { %p1137_p11 = por %p1136_p10, %p1135_p9 }
 0x3fc   : > { %p1133_p8 = pneg %p1132_p7 }
 0x3fe   : > { %p1138_p12 = pnand %p1137_p11, %p1133_p8 }
 0x400   : > { %1141 = shalt.err (!%p1138_p12)
}
 0x401   : > { %1040 = dma.vmem_to_hbm [thread:$0]  (%p1281_p5), %s894_s29, 128, %s1391_s16, %s879_s19  }
 0x402 PF: > { %p1046_p13 = scmp.ge.s32.totalorder %s1176_s20, 2  ;;  %s905_s14 = sand.u32 1, %s1164_s17  }
 0x403   : > { %s906_s26 = scalar_lea.sflag [#allocation3], %s905_s14 }
 0x404   : > { %p1043_p0 = pnand %p1046_p13, %p1285_p6 }
 0x406   : > { %p1044_p1 = pneg %p1043_p0 }
 0x408   : > { %1159 = dma.done.wait (%p1044_p1), %s906_s26, 128  }
 0x409   : > { %1161 = vsyncadd (%p1044_p1), %s906_s26, 4294967168  ;;  %s1446_s20 = sld [smem:[#allocation6_spill]]  ;;  %s1449_s17 = smov %s1168_s18 }
 0x40a   : > { %s1447_s21 = sld [smem:[#allocation5_spill]] }
 0x40b   : > { %s1448_s19 = sld [smem:[#allocation7_spill]] }
 0x40f   : > { %p21_p2 = scmp.ge.s32.totalorder %s1446_s20, 4  }
 0x410   : > { %s1450_s18 = smov %s1447_s21 }
 0x411   :  { %23 = sbr.rel (!%p21_p2) target bundleno = 3 (0x3), region = 99 }
 0x416   :  { %911 = vsyncpa [#allocation3], 1 }
 0x417   :  { %913 = vsyncpa [#allocation3 + $0x1], 1 }

// kernel: tpu_custom_call.1
= control target key start
LH: loop header
LB: loop body
LE: loop exit
PB: predicated region body
PF: predicated region fallthrough
CT: control target
= control target key end

     0   :  { %16 = vsyncpa [#allocation3], 0  ;;  %s1426_s0 = inlined_call_operand.vmem [shape: f32[2,4,256], index: 0, kind: input, shape index: {}]   ;;  %s1427_s1 = inlined_call_operand.vmem [shape: bf16[256,32], index: 1, kind: input, shape index: {}]   ;;  %s1428_s2 = inlined_call_operand.vmem [shape: f32[1,32], index: 2, kind: input, shape index: {}]   ;;  %s1429_s3 = inlined_call_operand.vmem [shape: bf16[16,256], index: 3, kind: input, shape index: {}]   ;;  %s1430_s4 = inlined_call_operand.vmem [shape: bf16[16,256], index: 4, kind: input, shape index: {}]   ;;  %s1431_s5 = inlined_call_operand.vmem [shape: f32[8,4], index: 5, kind: input, shape index: {}]   ;;  %s1432_s6 = inlined_call_operand.vmem [shape: f32[8,1], index: 6, kind: input, shape index: {}]   ;;  %s1433_s7 = inlined_call_operand.vmem [shape: f32[4,8], index: 7, kind: input, shape index: {}]   ;;  %s1434_s8 = inlined_call_operand.vmem [shape: f32[4,1], index: 8, kind: input, shape index: {}]   ;;  %s1435_s9 = inlined_call_operand.vmem [shape: f32[4,8], index: 9, kind: input, shape index: {}]   ;;  %s1436_s10 = inlined_call_operand.vmem [shape: f32[4,1], index: 10, kind: input, shape index: {}]   ;;  %s1437_s11 = inlined_call_operand.hbm [shape: f32[2,4,256], index: 11, kind: output, shape index: {}]  }
   0x1   :  { %18 = vsyncpa [#allocation3 + $0x1], 0  ;;  %s1243_s17 = smov 0   ;;  %s1245_s18 = smov 0  }
   0x2   :  { %s1247_s19 = smov 0   ;;  %s1249_s20 = smov 0  }
   0x3 LB: > { %1441 = sst [smem:[#allocation5_spill]] %s1172_s19  ;;  %s1264_s21 = sadd.s32 4294967295, %s1176_s20   ;;  %s1176_s20 = sphi %s1249_s20, %s1446_s20   ;;  %s1172_s19 = sphi %s1247_s19, %s1448_s19   ;;  %s1168_s18 = sphi %s1245_s18, %s1450_s18   ;;  %s1164_s17 = sphi %s1243_s17, %s1449_s17  }
   0x4   : > { %s952_s22 = sadd.s32 4294967294, %s1176_s20   ;;  %s1268_s23 = sadd.s32 1, %s1176_s20  }
   0x5   : > { %1442 = sst [smem:[#allocation6_spill]] %s1268_s23  ;;  %s267_s24 = sadd.s32 1, %s1172_s19 }
   0x6   : > { %s264_s25 = ssub.s32 %s1176_s20, %s1268_s23  ;;  %p277_p0 = scmp.ne.s32.totalorder %s1172_s19, %s1168_s18 }
   0x7   : > { %p265_p1 = scmp.eq.s32.totalorder %s264_s25, 0  ;;  %p278_p2 = scmp.eq.s32.totalorder %s1264_s21, 1 }
   0x8   : > { %p283_p3 = scmp.ne.s32.totalorder %s1168_s18, %s1164_s17  ;;  %p284_p4 = scmp.eq.s32.totalorder %s952_s22, 1 }
   0x9   : > { %s1279_s26 = scalar_select %p265_p1, %s1172_s19, %s267_s24  }
   0xa   : > { %p1281_p5 = por %p278_p2, %p277_p0  ;;  %p1285_p6 = por %p284_p4, %p283_p3 }
   0xb   : > { %1443 = sst [smem:[#allocation7_spill]] %s1279_s26  ;;  %p955_p7 = scmp.ge.s32.totalorder %s1176_s20, 1 }
   0xc   : > { %p340_p8 = scmp.lt.s32.totalorder %s1176_s20, 3 }
   0xe   : > { %p341_p9 = pnand %p955_p7, %p340_p8 }
   0xf   : > { %p380_p10 = scmp.lt.s32.totalorder (!%p341_p9), %s1264_s21, 1  ;;  %s377_s24 = sand.u32 (!%p341_p9), 1, %s1168_s18  }
  0x10   : > { %344 = sbr.rel (%p341_p9) target bundleno = 1026 (0x402), region = 64  ;;  %s956_s25 = sshll.u32 (!%p341_p9), %s377_s24, 3 }
  0x11   : > { %s379_s12 = scalar_lea.vmem (!%p341_p9), [#allocation2], %s956_s25  ;;  %s879_s19 = scalar_lea.sflag (!%p341_p9), [#allocation3], %s377_s24 }
  0x15   : > { %v1085_v0 = vld [vmem:[%s1427_s1 + $0x78] sm:$0xff]   ;;  %v1087_v2 = vld [vmem:[%s1427_s1 + $0x70] sm:$0xff]   ;;  %v1089_v4 = vld [vmem:[%s1427_s1 + $0x68] sm:$0xff]   ;;  %s381_s29 = scalar_select %p380_p10, %s1264_s21, 1  ;;  %v1178_v20 = vmov 0.0   ;;  %vm1179_vm0 = vmmov 0  }
  0x16   : > { %v1086_v1 = vld [vmem:[%s1427_s1 + $0x38] sm:$0xff]   ;;  %994 = vmatprep.subr.bf16.mxu0 %v1085_v0  ;;  %v1088_v3 = vld [vmem:[%s1427_s1 + $0x30] sm:$0xff]   ;;  %v1090_v5 = vld [vmem:[%s1427_s1 + $0x28] sm:$0xff]   ;;  %1022 = vmatprep.subr.bf16.mxu1 %v1178_v20  ;;  %v1180_v22 = vmov 0   ;;  %vm601_vm1 = vcmask 1041408   ;;  %vm597_vm2 = vcmask 31744  }
  0x17   : > { %995 = vmatpush3.bf16.msra.mxu0 %v1086_v1  ;;  %v1091_v6 = vld [vmem:[%s1427_s1 + $0x60] sm:$0xff]   ;;  %s992_s15 = sshll.u32 %s381_s29, 3  ;;  %v1093_v8 = vld [vmem:[%s1427_s1 + $0x58] sm:$0xff]   ;;  %v1095_v10 = vld [vmem:[%s1427_s1 + $0x50] sm:$0xff]   ;;  %1024 = vmatprep.mubr.msk.bf16.mxu1 %vm1179_vm0, %v1178_v20  ;;  %vm655_vm3 = vcmask 1043456   ;;  %vm651_vm4 = vcmask 64512  }
  0x18   : > { %996 = vmatprep.subr.bf16.mxu0 %v1087_v2  ;;  %v1092_v7 = vld [vmem:[%s1427_s1 + $0x20] sm:$0xff]   ;;  %s384_s30 = scalar_lea.vmem %s1426_s0, %s992_s15  ;;  %v1094_v9 = vld [vmem:[%s1427_s1 + $0x18] sm:$0xff]   ;;  %v1096_v13 = vld [vmem:[%s1427_s1 + $0x10] sm:$0xff]   ;;  %1083 = vset.pattern.permute.xlu0 %v1180_v22  ;;  %vm771_vm5 = vcmask 130048   ;;  %s893_s29 = sshll.u32 %s379_s12, 4  ;;  %s894_s29 = int_to_ptr.vmem [resolvable:$true] %s893_s29 }
  0x19   : > { %v447_v11 = vld [vmem:[%s384_s30] sm:$0xff]  ;;  %v1097_v15 = vld [vmem:[%s1427_s1 + $0x48] sm:$0xff]   ;;  %1084 = vset.pattern.permute.xlu1 %v1180_v22  ;;  %s1181_s30 = smov 112   ;;  %s1116_s26 = scalar_lea.vmem %s894_s29, 128 }
  0x1a   : > { %v449_v12 = vcombine.high %v447_v11, %v447_v11  ;;  %v1098_v16 = vld [vmem:[%s1427_s1 + $0x8] sm:$0xff]   ;;  %v1099_v17 = vld [vmem:[%s1427_s1 + $0x40] sm:$0xff]   ;;  %v451_v19 = vpack.c.bf16 %v447_v11, %v447_v11  ;;  %p1117_p11 = scmp.ne.s32.totalorder %s894_s29, %s1116_s26 }
  0x1b   : > { %997 = vmatpush3.bf16.msra.mxu0 %v1088_v3  ;;  %v1100_v18 = vld [vmem:[%s1427_s1] sm:$0xff]  }
  0x1c   : > { %998 = vmatprep.subr.bf16.mxu0 %v1089_v4  ;;  %v452_v14 = vpack.c.bf16 %v449_v12, %v449_v12  ;;  %v429_v21 = vld [vmem:[%s1432_s6] sm:$0xff]  ;;  %p1118_p12 = pnand %p1117_p11, %p1281_p5 }
  0x1d   : > { %432 = vperm.xlu0 %1083, %v429_v21   ;;  %v975_v24 = vld [vmem:[%s1428_s2] ss:$0 sm:$0xff]  ;;  %v1104_v61 = vld [vmem:[%s1429_s3 + $0x4] ss:$8 sps:$4 sm:$0xff]  }
  0x1e   : > { %581 = vmatprep.mubr.bf16.mxu0 %v452_v14  ;;  %v423_v30 = vld [vmem:[%s1431_s5] sm:$0xff]  ;;  %p1119_p13 = pneg %p1118_p12 }
  0x1f   : > { %999 = vmatpush3.bf16.msra.mxu0 %v1090_v5  ;;  %v424_v33 = vpack.c.bf16 %v423_v30, %v423_v30  ;;  %v435_v42 = vld [vmem:[%s1434_s8] sm:$0xf]  ;;  %v1107_v1 = vld [vmem:[%s1430_s4 + $0x4] ss:$8 sps:$4 sm:$0xff]  }
  0x20   : > { %1000 = vmatprep.subr.bf16.mxu0 %v1091_v6  ;;  %438 = vperm.xlu1 %1084, %v435_v42   ;;  %v441_v44 = vld [vmem:[%s1436_s10] sm:$0xf] }
  0x21   : > { %v425_v47 = vld [vmem:[%s1433_s7] sm:$0xf] }
  0x22   : > { %v426_v50 = vpack.c.bf16 %v425_v47, %v425_v47  ;;  %v427_v51 = vld [vmem:[%s1435_s9] sm:$0xf] }
  0x23   : > { %1001 = vmatpush3.bf16.msra.mxu0 %v1092_v7  ;;  %v428_v54 = vpack.c.bf16 %v427_v51, %v427_v51  ;;  %v1102_v62 = vld [vmem:[%s1429_s3] ss:$8 sps:$4 sm:$0xff]  }
  0x24   : > { %1002 = vmatprep.subr.bf16.mxu0 %v1093_v8  ;;  %444 = vperm.xlu1 %1084, %v441_v44   ;;  %v1105_v4 = vld [vmem:[%s1430_s4] ss:$8 sps:$4 sm:$0xff]  }
  0x27   : > { %1003 = vmatpush3.bf16.msra.mxu0 %v1094_v9 }
  0x28   : > { %1004 = vmatprep.subr.bf16.mxu0 %v1095_v10 }
  0x2b   : > { %1005 = vmatpush3.bf16.msra.mxu0 %v1096_v13 }
  0x2c   : > { %1006 = vmatprep.subr.bf16.mxu0 %v1097_v15 }
  0x2f   : > { %1007 = vmatpush3.bf16.msra.mxu0 %v1098_v16 }
  0x30   : > { %1008 = vmatprep.subr.bf16.mxu0 %v1099_v17 }
  0x33   : > { %1009 = vmatpush3.bf16.msra.mxu0 %v1100_v18 }
  0x36   : > { %582 = vmatmul.mubr.bf16.vlgmr.msra.gmra.mxu0 %v451_v19 }
  0x98   : > { %v433_v34 = vpop.permute.xlu0 %432 }
  0x9b   : > { %v439_v55 = vpop.permute.xlu1 %438 }
  0x9f   : > { %v445_v6 = vpop.permute.xlu1 %444 }
  0xf6   : > { %v1010_v23 = vpop.f32.mrf.mxu0 }
  0xf8   : > { %v1011_v25 = vpop.f32.mrf.mxu0 }
  0xf9   : > { %v1012_v26 = vadd.f32 %v1011_v25, %v1010_v23 }
  0xfa   : > { %v1013_v27 = vpop.f32.mrf.mxu0 }
  0xfb   : > { %v595_v28 = vmul.f32 %v1012_v26, %v975_v24 }
  0xfc   : > { %v1014_v29 = vpop.f32.mrf.mxu0 }
  0xfd   : > { %v596_v31 = vpack.c.bf16 %v595_v28, %v595_v28 }
  0xff   : > { %v603_v32 = vsel %vm601_vm1, %v596_v31, 0 }
 0x100   : > { %1023 = vmatpush3.bf16.msra.mxu1 %v603_v32 }
 0x101   : > { %1028 = vmatprep.subr.bf16.mxu1 %v1178_v20 }
 0x103   : > { %1025 = vmatmul.mubr.msk.bf16.vlgmr.msra.gmra.mxu1 %vm597_vm2, %v424_v33 }
 0x104   : > { %1030 = vmatprep.mubr.msk.bf16.mxu1 %vm1179_vm0, %v1178_v20 }
 0x1c3   : > { %v639_v35 = vpop.f32.mrf.mxu1 }
 0x1c4   : > { %v640_v36 = vadd.f32 %v639_v35, %v433_v34 }
 0x1c5   : > { %v1026_v37 = vpop.f32.mrf.mxu1 }
 0x1c6   : > { %v645_v38 = vadd.f32 3.0, %v640_v36 }
 0x1c7   : > { %v642_v39 = vpop.f32.mrf.mxu1 }
 0x1c8   : > { %v646_v40 = vmax.f32 %v645_v38, 0.0 }
 0x1c9   : > { %v1027_v41 = vpop.f32.mrf.mxu1 }
 0x1ca   : > { %v647_v43 = vmin.f32 %v646_v40, 6.0 }
 0x1cc   : > { %v648_v45 = vmul.f32 %v647_v43, %v640_v36 }
 0x1ce   : > { %v649_v46 = vmul.f32 0.16666667, %v648_v45 }
 0x1d0   : > { %v650_v48 = vpack.c.bf16 %v649_v46, %v649_v46 }
 0x1d2   : > { %706 = vrot.lane.b32.xlu0 %v650_v48, %s1181_s30  ;;  %v657_v49 = vsel %vm655_vm3, %v650_v48, 0  ;;  %s993_s30 = sshll.u32 %s1264_s21, 7  ;;  %s1182_s21 = smov [#allocation2]  }
 0x1d3   : > { %1029 = vmatpush3.bf16.msra.mxu1 %v657_v49  ;;  %s1391_s16 = scalar_lea.hbm %s1437_s11, %s993_s30  ;;  %s1120_s23 = sshll.u32 %s1182_s21, 4  ;;  %s1121_s23 = int_to_ptr.vmem [resolvable:$false] %s1120_s23 }
 0x1d4   : > { %1034 = vmatprep.subr.bf16.mxu1 %v1178_v20  ;;  %s1122_s15 = scalar_lea.vmem %s1121_s23, 256  ;;  %p1123_p0 = scmp.lt.s32.totalorder %s894_s29, %s1121_s23 }
 0x1d5   : > { %p1124_p1 = scmp.lt.s32.totalorder %s1122_s15, %s1116_s26 }
 0x1d6   : > { %1031 = vmatmul.mubr.msk.bf16.vlgmr.msra.gmra.mxu1 %vm651_vm4, %v426_v50 }
 0x1d7   : > { %1036 = vmatprep.mubr.msk.bf16.mxu1 %vm1179_vm0, %v1178_v20  ;;  %p1125_p2 = por %p1124_p1, %p1123_p0 }
 0x1d9   : > { %p1126_p3 = pnand %p1125_p2, %p1119_p13 }
 0x244   : > { %v707_v52 = vpop.permute.xlu0 %706 }
 0x245   : > { %v712_v53 = vsel %vm655_vm3, %v707_v52, 0 }
 0x246   : > { %1035 = vmatpush3.bf16.msra.mxu1 %v712_v53 }
 0x247   : > { %789 = vmatprep.subr.bf16.mxu1 %v1104_v61 }
 0x249   : > { %1037 = vmatmul.mubr.msk.bf16.vlgmr.msra.gmra.mxu1 %vm651_vm4, %v428_v54 }
 0x24a   : > { %807 = vmatprep.mubr.bf16.mxu1 %v1180_v22  ;;  %790 = vmatpush1.bf16.msra.mxu1 %v1102_v62 }
 0x24b   : > { %844 = vmatprep.subr.bf16.mxu1 %v1107_v1 }
 0x296   : > { %v693_v56 = vpop.f32.mrf.mxu1 }
 0x297   : > { %v694_v57 = vadd.f32 %v693_v56, %v439_v55 }
 0x298   : > { %v1032_v58 = vpop.f32.mrf.mxu1 }
 0x299   : > { %v978_v59 = vmul.f32 -1.442695, %v694_v57 }
 0x29a   : > { %v696_v60 = vpop.f32.mrf.mxu1 }
 0x29b   : > { %1108 = vpow2.f32 %v978_v59 }
 0x29c   : > { %v1033_v63 = vpop.f32.mrf.mxu1 }
 0x2a8   : > { %v1109_v0 = vpop.eup %1108 }
 0x2a9   : > { %v702_v2 = vadd.f32 1.0, %v1109_v0 }
 0x2ab   : > { %1110 = vrcp.f32 %v702_v2 }
 0x2b8   : > { %v1111_v3 = vpop.eup %1110 }
 0x2b9   : > { %v760_v5 = vpack.c.bf16 %v1111_v3, %v1111_v3 }
 0x2bb   : > { %983 = vmatmul.mubr.msk.bf16.vlgmr.msra.gmra.mxu1 %vm771_vm5, %v760_v5 }
 0x2bc   : > { %845 = vmatpush1.bf16.msra.mxu1 %v1105_v4  ;;  %862 = vmatprep.mubr.bf16.mxu1 %v1180_v22 }
 0x309   : > { %v748_v7 = vpop.f32.mrf.mxu1 }
 0x30a   : > { %v749_v8 = vadd.f32 %v748_v7, %v445_v6 }
 0x30b   : > { %v1038_v9 = vpop.f32.mrf.mxu1 }
 0x30c   : > { %v980_v10 = vmul.f32 -1.442695, %v749_v8 }
 0x30d   : > { %v751_v11 = vpop.f32.mrf.mxu1 }
 0x30e   : > { %1112 = vpow2.f32 %v980_v10 }
 0x30f   : > { %v1039_v12 = vpop.f32.mrf.mxu1 }
 0x31b   : > { %v1113_v13 = vpop.eup %1112 }
 0x31c   : > { %v757_v14 = vadd.f32 1.0, %v1113_v13 }
 0x31e   : > { %1114 = vrcp.f32 %v757_v14 }
 0x32b   : > { %v1115_v15 = vpop.eup %1114 }
 0x32c   : > { %v816_v16 = vpack.c.bf16 %v1115_v15, %v1115_v15 }
 0x32e   : > { %986 = vmatmul.mubr.msk.bf16.vlgmr.msra.gmra.mxu1 %vm771_vm5, %v816_v16 }
 0x37b   : > { %v809_v17 = vpop.f32.mrf.mxu1 }
 0x37d   : > { %v811_v18 = vpop.f32.mrf.mxu1 }
 0x37f   : > { %v813_v19 = vpop.f32.mrf.mxu1 }
 0x381   : > { %v814_v20 = vpop.f32.mrf.mxu1 }
 0x3ee   : > { %v864_v21 = vpop.f32.mrf.mxu1 }
 0x3ef   : > { %v871_v23 = vmul.f32 %v864_v21, %v809_v17 }
 0x3f0   : > { %v866_v22 = vpop.f32.mrf.mxu1 }
 0x3f1   : > { %v872_v24 = vmul.f32 %v866_v22, %v811_v18 }
 0x3f2   : > { %v868_v25 = vpop.f32.mrf.mxu1 }
 0x3f3   : > { %v875_v26 = vcombine.low %v871_v23, %v872_v24 }
 0x3f4   : > { %v869_v27 = vpop.f32.mrf.mxu1 }
 0x3f5   : > { %877 = vst [vmem:[%s379_s12] sm:$0xff] %v875_v26 }
 0x3f6   : > { %1129 = shalt.err (!%p1126_p3)
}
 0x3f7   : > { %s1130_s22 = scalar_lea.hbm %s1391_s16, 128  ;;  %s1134_s30 = scalar_lea.hbm %s1437_s11, 256 }
 0x3f8   : > { %p1131_p4 = scmp.ne.s32.totalorder %s1391_s16, %s1130_s22  ;;  %p1135_p9 = scmp.lt.s32.totalorder %s1391_s16, %s1437_s11 }
 0x3f9   : > { %p1136_p10 = scmp.lt.s32.totalorder %s1134_s30, %s1130_s22 }
 0x3fa   : > { %p1132_p7 = pnand %p1131_p4, %p1281_p5 }
 0x3fb   : > { %p1137_p11 = por %p1136_p10, %p1135_p9 }
 0x3fc   : > { %p1133_p8 = pneg %p1132_p7 }
 0x3fe   : > { %p1138_p12 = pnand %p1137_p11, %p1133_p8 }
 0x400   : > { %1141 = shalt.err (!%p1138_p12)
}
 0x401   : > { %1040 = dma.vmem_to_hbm [thread:$0]  (%p1281_p5), %s894_s29, 128, %s1391_s16, %s879_s19  }
 0x402 PF: > { %p1046_p13 = scmp.ge.s32.totalorder %s1176_s20, 2  ;;  %s905_s14 = sand.u32 1, %s1164_s17  }
 0x403   : > { %s906_s26 = scalar_lea.sflag [#allocation3], %s905_s14 }
 0x404   : > { %p1043_p0 = pnand %p1046_p13, %p1285_p6 }
 0x406   : > { %p1044_p1 = pneg %p1043_p0 }
 0x408   : > { %1159 = dma.done.wait (%p1044_p1), %s906_s26, 128  }
 0x409   : > { %1161 = vsyncadd (%p1044_p1), %s906_s26, 4294967168  ;;  %s1446_s20 = sld [smem:[#allocation6_spill]]  ;;  %s1449_s17 = smov %s1168_s18 }
 0x40a   : > { %s1447_s21 = sld [smem:[#allocation5_spill]] }
 0x40b   : > { %s1448_s19 = sld [smem:[#allocation7_spill]] }
 0x40f   : > { %p21_p2 = scmp.ge.s32.totalorder %s1446_s20, 4  }
 0x410   : > { %s1450_s18 = smov %s1447_s21 }
 0x411   :  { %23 = sbr.rel (!%p21_p2) target bundleno = 3 (0x3), region = 99 }
 0x416   :  { %911 = vsyncpa [#allocation3], 1 }
 0x417   :  { %913 = vsyncpa [#allocation3 + $0x1], 1 }

</bundles_post_ra>
